<compile_context>
chip_gen: v7x
topology: tpu7x:2x2x1
jax: 0.10.0
libtpu: 0.0.40
codegen_flags: <defaults>
</compile_context>

<pallas_src>
import functools
import math

import jax
import jax.numpy as jnp
from jax import lax
from jax.experimental import pallas as pl
from jax.experimental.pallas import tpu as pltpu

NUM_GROUPS = 32
GN_EPS = 1e-5


# --------------------------------------------------------------------------------------
# Pass 1: per-(batch, channel) sum and sum-of-squares over HW tokens.
# --------------------------------------------------------------------------------------
def _gn_stats_kernel(x_ref, stats_ref):
    t = pl.program_id(1)

    @pl.when(t == 0)
    def _():
        stats_ref[...] = jnp.zeros_like(stats_ref)

    x = x_ref[0]                                                   # (TS, C) f32
    part = jnp.concatenate(
        [jnp.sum(x, axis=0, keepdims=True),
         jnp.sum(x * x, axis=0, keepdims=True)], axis=0)           # (2, C)
    stats_ref[0] = stats_ref[0] + part


# --------------------------------------------------------------------------------------
# Pass 2: GroupNorm apply + fused QKV projection (once per token, bf16 outputs).
# --------------------------------------------------------------------------------------
def _qkv_proj_kernel(x_ref, aff_ref, wq_ref, wk_ref, wv_ref,
                     bq_ref, bk_ref, bv_ref,
                     q_ref, kt_ref, v_ref):
    scale_c = aff_ref[0, 0:1, :]                                   # (1, C) f32
    shift_c = aff_ref[0, 1:2, :]                                   # (1, C) f32
    xn = (x_ref[0] * scale_c + shift_c).astype(jnp.bfloat16)       # (TP, C)

    q = jnp.dot(xn, wq_ref[...], preferred_element_type=jnp.float32) + bq_ref[...]
    k = jnp.dot(xn, wk_ref[...], preferred_element_type=jnp.float32) + bk_ref[...]
    v = jnp.dot(xn, wv_ref[...], preferred_element_type=jnp.float32) + bv_ref[...]

    q_ref[0] = q.astype(jnp.bfloat16)                              # (TP, C)
    kt_ref[0] = k.T.astype(jnp.bfloat16)                           # K stored transposed (C, TP)
    v_ref[0] = v.astype(jnp.bfloat16)                              # (TP, C)


# --------------------------------------------------------------------------------------
# Pass 3: flash attention (online softmax) + output projection + residual.
# --------------------------------------------------------------------------------------
def _flash_attn_kernel(xres_ref, q_ref, kt_ref, v_ref, wo_ref, bo_ref,
                       o_ref, m_scr, l_scr, acc_scr, *, tk, kv_resident):
    ki = pl.program_id(1)

    @pl.when(ki == 0)
    def _():
        m_scr[...] = jnp.full_like(m_scr, -jnp.inf)
        l_scr[...] = jnp.zeros_like(l_scr)
        acc_scr[...] = jnp.zeros_like(acc_scr)

    if kv_resident:
        start = pl.multiple_of(ki * tk, tk)
        kt = kt_ref[0, :, pl.ds(start, tk)]                        # (C, TK) bf16
        v = v_ref[0, pl.ds(start, tk), :]                          # (TK, C) bf16
    else:
        kt = kt_ref[0]                                             # (C, TK) bf16
        v = v_ref[0]                                               # (TK, C) bf16

    # q already pre-scaled by 1/sqrt(C); K stored transposed -> native (M,K)x(K,N) matmul.
    s = jnp.dot(q_ref[0], kt, preferred_element_type=jnp.float32)  # (TQ, TK)

    m_prev = m_scr[...]
    m_new = jnp.maximum(m_prev, jnp.max(s, axis=-1, keepdims=True))
    alpha = jnp.exp(m_prev - m_new)
    p = jnp.exp(s - m_new)
    l_scr[...] = alpha * l_scr[...] + jnp.sum(p, axis=-1, keepdims=True)
    acc_scr[...] = alpha * acc_scr[...] + jnp.dot(
        p.astype(jnp.bfloat16), v, preferred_element_type=jnp.float32)
    m_scr[...] = m_new

    @pl.when(ki == pl.num_programs(1) - 1)
    def _():
        inv_l = pl.reciprocal(l_scr[...], approx=True)             # EUP slot
        attn = (acc_scr[...] * inv_l).astype(jnp.bfloat16)         # (TQ, C)
        out = jnp.dot(attn, wo_ref[...], preferred_element_type=jnp.float32) + bo_ref[...]
        o_ref[0] = out + xres_ref[0]                               # residual add (f32)


# --------------------------------------------------------------------------------------
# Wrappers
# --------------------------------------------------------------------------------------
def _pick_tile(n, target):
    for c in (2048, 1024, 512, 256, 128, 64, 32, 16, 8):
        if c <= target and c <= n and n % c == 0:
            return c
    return n  # TODO(synk): pad HW instead of falling back to the full extent.


def vae_attention_tokens(x_tok, params, *, tq=256, tk=1024, tp=512, ts=1024):
    """Token-major entry point.  x_tok: (N, HW, C) f32.  Returns (N, HW, C) f32."""
    N, HW, C = x_tok.shape
    assert C % NUM_GROUPS == 0, "GroupNorm(32, C) requires C % 32 == 0"
    x_tok = x_tok.astype(jnp.float32)

    TS = _pick_tile(HW, ts)
    TP = _pick_tile(HW, tp)
    TQ = _pick_tile(HW, tq)
    TK = _pick_tile(HW, tk)

    gamma = params["gn_gamma"].astype(jnp.float32)
    beta = params["gn_beta"].astype(jnp.float32)

    inv_sqrt_d = 1.0 / math.sqrt(C)                      # single head -> d_head = C
    w_in = params["w_in"].astype(jnp.float32)
    b_in = params["b_in"].astype(jnp.float32)
    wq = (w_in[:, :C] * inv_sqrt_d).astype(jnp.bfloat16)          # 1/sqrt(C) folded in f32
    wk = w_in[:, C:2 * C].astype(jnp.bfloat16)
    wv = w_in[:, 2 * C:].astype(jnp.bfloat16)
    bq = (b_in[:C] * inv_sqrt_d).reshape(1, C).astype(jnp.float32)
    bk = b_in[C:2 * C].reshape(1, C).astype(jnp.float32)
    bv = b_in[2 * C:].reshape(1, C).astype(jnp.float32)
    wo = params["w_out"].astype(jnp.bfloat16)                     # (C, C)
    bo = params["b_out"].reshape(1, C).astype(jnp.float32)

    # ---- Pass 1: GroupNorm statistics (Pallas) ----
    stats = pl.pallas_call(
        _gn_stats_kernel,
        out_shape=jax.ShapeDtypeStruct((N, 2, C), jnp.float32),
        grid_spec=pltpu.PrefetchScalarGridSpec(
            num_scalar_prefetch=0,
            grid=(N, HW // TS),
            in_specs=[pl.BlockSpec((1, TS, C), lambda b, t: (b, t, 0))],
            out_specs=pl.BlockSpec((1, 2, C), lambda b, t: (b, 0, 0)),
        ),
        compiler_params=pltpu.CompilerParams(
            dimension_semantics=("parallel", "arbitrary")),
    )(x_tok)

    # Tiny group-level math (O(N*C)) in plain JAX: mean/var per group -> per-channel affine.
    cg = C // NUM_GROUPS
    cnt = jnp.float32(HW * cg)
    gsum = stats[:, 0, :].reshape(N, NUM_GROUPS, cg).sum(-1)      # (N, G)
    gsq = stats[:, 1, :].reshape(N, NUM_GROUPS, cg).sum(-1)       # (N, G)
    mean = gsum / cnt
    # TODO(synk): E[x^2]-E[x]^2 in f32 loses precision for strongly biased activations;
    # switch to shifted sums if tighter PyTorch-matching accuracy is ever required.
    var = gsq / cnt - mean * mean                                 # biased (PyTorch)
    inv = lax.rsqrt(var + GN_EPS)
    scale_c = jnp.repeat(inv, cg, axis=-1) * gamma[None, :]       # (N, C)
    shift_c = beta[None, :] - jnp.repeat(mean, cg, axis=-1) * scale_c
    aff = jnp.stack([scale_c, shift_c], axis=1).astype(jnp.float32)  # (N, 2, C)

    # ---- Pass 2: GroupNorm apply + QKV projection -> bf16 q, K^T, V (once per token) ----
    const2 = lambda shape: pl.BlockSpec(shape, lambda b, t: (0, 0))
    q, kt, v = pl.pallas_call(
        _qkv_proj_kernel,
        out_shape=(jax.ShapeDtypeStruct((N, HW, C), jnp.bfloat16),
                   jax.ShapeDtypeStruct((N, C, HW), jnp.bfloat16),
                   jax.ShapeDtypeStruct((N, HW, C), jnp.bfloat16)),
        grid_spec=pltpu.PrefetchScalarGridSpec(
            num_scalar_prefetch=0,
            grid=(N, HW // TP),
            in_specs=[
                pl.BlockSpec((1, TP, C), lambda b, t: (b, t, 0)),
                pl.BlockSpec((1, 2, C), lambda b, t: (b, 0, 0)),
                const2((C, C)), const2((C, C)), const2((C, C)),   # Wq, Wk, Wv (bf16)
                const2((1, C)), const2((1, C)), const2((1, C)),   # bq, bk, bv (f32)
            ],
            out_specs=[
                pl.BlockSpec((1, TP, C), lambda b, t: (b, t, 0)),  # q
                pl.BlockSpec((1, C, TP), lambda b, t: (b, 0, t)),  # K^T (C-major)
                pl.BlockSpec((1, TP, C), lambda b, t: (b, t, 0)),  # V
            ],
        ),
        compiler_params=pltpu.CompilerParams(
            dimension_semantics=("parallel", "parallel"),
            vmem_limit_bytes=48 * 1024 * 1024),
    )(x_tok, aff, wq, wk, wv, bq, bk, bv)

    # ---- Pass 3: flash attention + output projection + residual ----
    n_q = HW // TQ
    n_k = HW // TK
    # Hold K^T + V resident in VMEM if the double-buffered bf16 footprint is <= 24 MiB
    # (safe on v5e/v6e 128 MiB and v7x 64 MiB, given the 48 MiB limit below).
    kv_resident = (8 * HW * C) <= 24 * 1024 * 1024

    if kv_resident:
        kt_spec = pl.BlockSpec((1, C, HW), lambda i, ki: (i // n_q, 0, 0))
        v_spec = pl.BlockSpec((1, HW, C), lambda i, ki: (i // n_q, 0, 0))
    else:
        # TODO(synk): deeper buffering (pl.Buffered(3)) on these KV specs would hide the
        # per-step KV DMA latency on v7x when residency does not fit.
        kt_spec = pl.BlockSpec((1, C, TK), lambda i, ki: (i // n_q, 0, ki))
        v_spec = pl.BlockSpec((1, TK, C), lambda i, ki: (i // n_q, ki, 0))

    const3 = lambda shape: pl.BlockSpec(shape, lambda i, ki: (0, 0))
    out = pl.pallas_call(
        functools.partial(_flash_attn_kernel, tk=TK, kv_resident=kv_resident),
        out_shape=jax.ShapeDtypeStruct((N, HW, C), jnp.float32),
        grid_spec=pltpu.PrefetchScalarGridSpec(
            num_scalar_prefetch=0,
            grid=(N * n_q, n_k),   # flattened (batch, q-tile): both TCs busy even at N==1
            in_specs=[
                pl.BlockSpec((1, TQ, C), lambda i, ki: (i // n_q, i % n_q, 0)),  # residual x
                pl.BlockSpec((1, TQ, C), lambda i, ki: (i // n_q, i % n_q, 0)),  # q (bf16)
                kt_spec,                                                          # K^T (bf16)
                v_spec,                                                           # V  (bf16)
                const3((C, C)),                                                   # Wo (bf16)
                const3((1, C)),                                                   # bo (f32)
            ],
            out_specs=pl.BlockSpec((1, TQ, C), lambda i, ki: (i // n_q, i % n_q, 0)),
            scratch_shapes=[
                pltpu.VMEM((TQ, 1), jnp.float32),   # running max
                pltpu.VMEM((TQ, 1), jnp.float32),   # running sum
                pltpu.VMEM((TQ, C), jnp.float32),   # output accumulator
            ],
        ),
        compiler_params=pltpu.CompilerParams(
            dimension_semantics=("parallel", "arbitrary"),
            vmem_limit_bytes=48 * 1024 * 1024),
    )(x_tok, q, kt, v, wo, bo)

    return out


def vae_attention_block(x_nchw, params):
    """PyTorch-compatible NCHW entry point.  x_nchw: (N, C, H, W).  Returns (N, C, H, W)."""
    N, C, H, W = x_nchw.shape
    HW = H * W
    # TODO(synk): avoid this NCHW<->token round trip by keeping the model token-major.
    x_tok = jnp.transpose(x_nchw.reshape(N, C, HW), (0, 2, 1)).astype(jnp.float32)
    out = vae_attention_tokens(x_tok, params)
    return jnp.transpose(out, (0, 2, 1)).reshape(N, C, H, W).astype(x_nchw.dtype)


# --------------------------------------------------------------------------------------
# Pure-JAX reference + test harness
# --------------------------------------------------------------------------------------
def _reference(x_nchw, params):
    N, C, H, W = x_nchw.shape
    HW = H * W
    residue = x_nchw
    xg = x_nchw.reshape(N, NUM_GROUPS, C // NUM_GROUPS, H, W)
    mean = jnp.mean(xg, axis=(2, 3, 4), keepdims=True)
    var = jnp.var(xg, axis=(2, 3, 4), keepdims=True)
    xn = ((xg - mean) / jnp.sqrt(var + GN_EPS)).reshape(N, C, H, W)
    xn = xn * params["gn_gamma"].reshape(1, C, 1, 1) + params["gn_beta"].reshape(1, C, 1, 1)
    t = jnp.transpose(xn.reshape(N, C, HW), (0, 2, 1))           # (N, HW, C)
    qkv = t @ params["w_in"] + params["b_in"]
    q, k, v = qkv[..., :C], qkv[..., C:2 * C], qkv[..., 2 * C:]
    s = jnp.einsum("nqc,nkc->nqk", q, k) / jnp.sqrt(jnp.float32(C))
    p = jax.nn.softmax(s, axis=-1)
    o = jnp.einsum("nqk,nkc->nqc", p, v) @ params["w_out"] + params["b_out"]
    return jnp.transpose(o, (0, 2, 1)).reshape(N, C, H, W) + residue


def make_params(key, C):
    ks = jax.random.split(key, 6)
    scale = 0.05
    return {
        "gn_gamma": jax.random.normal(ks[0], (C,), jnp.float32) * 0.1 + 1.0,
        "gn_beta": jax.random.normal(ks[1], (C,), jnp.float32) * 0.1,
        "w_in": jax.random.normal(ks[2], (C, 3 * C), jnp.float32) * scale,
        "b_in": jax.random.normal(ks[3], (3 * C,), jnp.float32) * scale,
        "w_out": jax.random.normal(ks[4], (C, C), jnp.float32) * scale,
        "b_out": jax.random.normal(ks[5], (C,), jnp.float32) * scale,
    }


if __name__ == "__main__":
    key = jax.random.PRNGKey(0)
    kx, kp = jax.random.split(key)

    N, C, H, W = 2, 64, 16, 16        # C must be a multiple of 32 (GroupNorm groups)
    x = jax.random.normal(kx, (N, C, H, W), jnp.float32)
    params = make_params(kp, C)

    out = jax.block_until_ready(vae_attention_block(x, params))
    ref = _reference(x, params)

    assert out.shape == (N, C, H, W)
    err = float(jnp.max(jnp.abs(out - ref)))
    # bf16 MXU matmuls with f32 accumulation -> tolerance looser than a pure-f32 reference.
    assert jnp.allclose(out, ref, rtol=2e-2, atol=2e-2), f"max abs err {err}"

    print("KERNEL_OK")
</pallas_src>

<mosaic_0001>
module attributes {stable_mosaic.version = 11 : i64} {
  func.func @_gn_stats_kernel(%arg0: i32, %arg1: i32, %arg2: memref<1x256x64xf32, #tpu.memory_space<vmem>>, %arg3: memref<1x2x64xf32, #tpu.memory_space<vmem>>) attributes {dimension_semantics = [#tpu.dimension_semantics<parallel>, #tpu.dimension_semantics<arbitrary>], iteration_bounds = array<i64: 2, 1>, scalar_prefetch = 0 : i64, scratch_operands = 0 : i64, tpu.core_type = #tpu.core_type<tc>, window_params = [{transform_indices = @transform_0, window_bounds = array<i64: 1, 256, 64>}, {transform_indices = @transform_1, window_bounds = array<i64: 1, 2, 64>}]} {
    %c0_i32 = arith.constant 0 : i32
    %0 = arith.cmpi eq, %arg1, %c0_i32 : i32
    %1 = arith.extui %0 : i1 to i32
    %c0_i32_0 = arith.constant 0 : i32
    %2 = arith.cmpi ne, %1, %c0_i32_0 : i32
    scf.if %2 {
      %cst_10 = arith.constant 0.000000e+00 : f32
      %17 = vector.broadcast %cst_10 : f32 to vector<1x2x64xf32>
      %c0_11 = arith.constant 0 : index
      %c0_12 = arith.constant 0 : index
      %c0_13 = arith.constant 0 : index
      %18 = vector.load %arg3[%c0_11, %c0_12, %c0_13] : memref<1x2x64xf32, #tpu.memory_space<vmem>>, vector<1x2x64xf32>
      tpu.vector_store %arg3[%c0_11, %c0_12, %c0_13], %17 {strides = array<i32>} : memref<1x2x64xf32, #tpu.memory_space<vmem>>, vector<1x2x64xf32>,
    } else {
    }
    %c0 = arith.constant 0 : index
    %c0_1 = arith.constant 0 : index
    %c0_2 = arith.constant 0 : index
    %3 = vector.load %arg2[%c0, %c0_1, %c0_2] : memref<1x256x64xf32, #tpu.memory_space<vmem>>, vector<1x256x64xf32>
    %4 = vector.shape_cast %3 : vector<1x256x64xf32> to vector<256x64xf32>
    %cst = arith.constant dense<0.000000e+00> : vector<64xf32>
    %5 = vector.multi_reduction <add>, %4, %cst [0] : vector<256x64xf32> to vector<64xf32>
    %6 = vector.shape_cast %5 : vector<64xf32> to vector<1x64xf32>
    %7 = arith.mulf %4, %4 : vector<256x64xf32>
    %cst_3 = arith.constant dense<0.000000e+00> : vector<64xf32>
    %8 = vector.multi_reduction <add>, %7, %cst_3 [0] : vector<256x64xf32> to vector<64xf32>
    %9 = vector.shape_cast %8 : vector<64xf32> to vector<1x64xf32>
    %10 = tpu.concatenate %6, %9 in 0 : vector<1x64xf32>, vector<1x64xf32> -> vector<2x64xf32>
    %c0_4 = arith.constant 0 : index
    %c0_5 = arith.constant 0 : index
    %c0_6 = arith.constant 0 : index
    %11 = vector.load %arg3[%c0_4, %c0_5, %c0_6] : memref<1x2x64xf32, #tpu.memory_space<vmem>>, vector<1x2x64xf32>
    %12 = vector.shape_cast %11 : vector<1x2x64xf32> to vector<2x64xf32>
    %13 = arith.addf %12, %10 : vector<2x64xf32>
    %c0_7 = arith.constant 0 : index
    %c0_8 = arith.constant 0 : index
    %c0_9 = arith.constant 0 : index
    %14 = vector.load %arg3[%c0_7, %c0_8, %c0_9] : memref<1x2x64xf32, #tpu.memory_space<vmem>>, vector<1x2x64xf32>
    %15 = vector.shape_cast %14 : vector<1x2x64xf32> to vector<2x64xf32>
    %16 = vector.shape_cast %13 : vector<2x64xf32> to vector<1x2x64xf32>
    tpu.vector_store %arg3[%c0_7, %c0_8, %c0_9], %16 {strides = array<i32>} : memref<1x2x64xf32, #tpu.memory_space<vmem>>, vector<1x2x64xf32>,
    return
  }
  func.func @transform_0(%arg0: i32, %arg1: i32) -> (i32, i32, i32) {
    %c0_i32 = arith.constant 0 : i32
    %c0_i32_0 = arith.constant 0 : i32
    return %arg0, %arg1, %c0_i32 : i32, i32, i32
  }
  func.func @transform_1(%arg0: i32, %arg1: i32) -> (i32, i32, i32) {
    %c0_i32 = arith.constant 0 : i32
    %c0_i32_0 = arith.constant 0 : i32
    %c0_i32_1 = arith.constant 0 : i32
    return %arg0, %c0_i32, %c0_i32_0 : i32, i32, i32
  }
}

</mosaic_0001>

<bundles_post_ra>
// kernel: tpu_custom_call.1
= control target key start
LH: loop header
LB: loop body
LE: loop exit
PB: predicated region body
PF: predicated region fallthrough
CT: control target
= control target key end

     0   :  { %6 = vsyncpa [#allocation3], 0  ;;  %s828_s0 = inlined_call_operand.vmem [shape: f32[2,256,64], index: 0, kind: input, shape index: {}]   ;;  %s829_s1 = inlined_call_operand.hbm [shape: f32[2,2,64], index: 1, kind: output, shape index: {}]  }
   0x1   :  { %8 = vsyncpa [#allocation3 + $0x1], 0  ;;  %s606_s6 = smov 0   ;;  %s608_s7 = smov 0  }
   0x2   :  { %s610_s8 = smov 0   ;;  %s612_s9 = smov 0  }
   0x3   :  { %s614_s10 = smov 0   ;;  %s616_s11 = smov 0  }
   0x4 LB: > { %s445_s12 = sadd.s32 4294967295, %s592_s11   ;;  %s446_s13 = sadd.s32 4294967294, %s592_s11   ;;  %s592_s11 = sphi %s616_s11, %s14_s11   ;;  %s588_s10 = sphi %s614_s10, %s836_s10   ;;  %s584_s9 = sphi %s612_s9, %s835_s9   ;;  %s580_s8 = sphi %s610_s8, %s834_s8   ;;  %s576_s7 = sphi %s608_s7, %s833_s7   ;;  %s572_s6 = sphi %s606_s6, %s832_s6  }
   0x5   : > { %s26_s14 = sadd.s32 1, %s588_s10  ;;  %s61_s15 = sadd.s32 1, %s580_s8 }
   0x6   : > { %p28_p0 = scmp.ge.s32.totalorder %s26_s14, 2  ;;  %p71_p1 = scmp.ne.s32.totalorder %s580_s8, %s576_s7 }
   0x7   : > { %p72_p2 = scmp.eq.s32.totalorder %s445_s12, 1  ;;  %p77_p3 = scmp.ne.s32.totalorder %s576_s7, %s572_s6 }
   0x8   : > { %s838_s14 = smov (%p28_p0, %s26_s14), 0  ;;  %p78_p5 = scmp.eq.s32.totalorder %s446_s13, 1 }
   0x9   : > { %p646_p4 = por %p72_p2, %p71_p1  ;;  %s58_s17 = ssub.s32 %s588_s10, %s838_s14 }
   0xa   : > { %p449_p6 = scmp.ge.s32.totalorder %s592_s11, 1  ;;  %p59_p7 = scmp.eq.s32.totalorder %s58_s17, 0 }
   0xb   : > { %p653_p8 = por %p78_p5, %p77_p3  ;;  %p109_p9 = scmp.lt.s32.totalorder %s592_s11, 3 }
   0xc   : > { %s659_s19 = scalar_select %p59_p7, %s580_s8, %s61_s15  }
   0xd   : > { %p110_p10 = pnand %p449_p6, %p109_p9 }
   0xe   : > { %s130_s20 = sand.u32 (!%p110_p10), 1, %s576_s7   ;;  %p134_p11 = scmp.lt.s32.totalorder (!%p110_p10), %s584_s9, 1  ;;  %vm147_vm0 = vcmask (!%p110_p10), 517120   ;;  %v594_v0 = vmov (!%p110_p10), 0.0   ;;  %vm181_vm1 = vcmask (!%p110_p10), 523264   ;;  %vm352_vm2 = vcmask (!%p110_p10), 1040384  }
   0xf   : > { %113 = sbr.rel (%p110_p10) target bundleno = 124 (0x7c), region = 24  ;;  %s450_s21 = sshll.u32 (!%p110_p10), %s130_s20, 1 }
  0x10   : > { %s666_s23 = scalar_lea.vmem (!%p110_p10), [#allocation2], %s450_s21  ;;  %s454_s28 = sshll.u32 (!%p110_p10), %s584_s9, 5 }
  0x11   : > { %148 = vst.msk [vmem:[%s666_s23] sm:$0x3] (!%p110_p10), %vm147_vm0, %v594_v0  ;;  %s372_s29 = sshll.u32 (!%p110_p10), %s666_s23, 4  ;;  %s777_s3 = scalar_lea.hbm (!%p110_p10), %s829_s1, %s454_s28  ;;  %s779_s29 = int_to_ptr.vmem [resolvable:$true] %s372_s29 }
  0x12   : > { %s359_s4 = scalar_lea.sflag (!%p110_p10), [#allocation3], %s130_s20  ;;  %s514_s5 = scalar_lea.vmem (!%p110_p10), %s779_s29, 32 }
  0x13   : > { %p515_p12 = scmp.ne.s32.totalorder (!%p110_p10), %s779_s29, %s514_s5 }
  0x15   : > { %p516_p13 = pnand (!%p110_p10), %p515_p12, %p646_p4 }
  0x16   : > { %s135_s22 = scalar_select %p134_p11, %s584_s9, 1 }
  0x17   : > { %p517_p0 = pneg %p516_p13  ;;  %s595_s9 = smov [#allocation2]  }
  0x18   : > { %s457_s24 = sshll.u32 %s135_s22, 8  ;;  %s518_s12 = sshll.u32 %s595_s9, 4  ;;  %s519_s12 = int_to_ptr.vmem [resolvable:$false] %s518_s12 }
  0x19   : > { %s673_s27 = scalar_lea.vmem %s828_s0, %s457_s24  ;;  %s520_s13 = scalar_lea.vmem %s519_s12, 64 }
  0x1a   : > { %v149_v1 = vld [vmem:[%s673_s27] sm:$0xff]  ;;  %v150_v2 = vld [vmem:[%s673_s27 + $0x8] sm:$0xff]  ;;  %v151_v3 = vld [vmem:[%s673_s27 + $0x10] sm:$0xff]  ;;  %p521_p1 = scmp.lt.s32.totalorder %s779_s29, %s519_s12  ;;  %p522_p2 = scmp.lt.s32.totalorder %s520_s13, %s514_s5 }
  0x1b   : > { %v182_v4 = vsel %vm181_vm1, %v149_v1, 0.0  ;;  %v183_v5 = vsel %vm181_vm1, %v150_v2, 0.0  ;;  %v185_v6 = vsel %vm181_vm1, %v151_v3, 0.0  ;;  %v152_v7 = vld [vmem:[%s673_s27 + $0x18] sm:$0xff]  ;;  %v153_v10 = vld [vmem:[%s673_s27 + $0x20] sm:$0xff]  ;;  %v154_v13 = vld [vmem:[%s673_s27 + $0x28] sm:$0xff]  ;;  %v251_v28 = vmul.f32 %v149_v1, %v149_v1 }
  0x1c   : > { %v184_v8 = vadd.f32 %v183_v5, %v182_v4  ;;  %v187_v9 = vsel %vm181_vm1, %v152_v7, 0.0  ;;  %v189_v12 = vsel %vm181_vm1, %v153_v10, 0.0  ;;  %v191_v15 = vsel %vm181_vm1, %v154_v13, 0.0  ;;  %v155_v16 = vld [vmem:[%s673_s27 + $0x30] sm:$0xff]  ;;  %v156_v19 = vld [vmem:[%s673_s27 + $0x38] sm:$0xff]  ;;  %v157_v22 = vld [vmem:[%s673_s27 + $0x40] sm:$0xff]  ;;  %p523_p3 = por %p522_p2, %p521_p1 }
  0x1d   : > { %v193_v18 = vsel %vm181_vm1, %v155_v16, 0.0  ;;  %v195_v21 = vsel %vm181_vm1, %v156_v19, 0.0  ;;  %v197_v24 = vsel %vm181_vm1, %v157_v22, 0.0  ;;  %v158_v25 = vld [vmem:[%s673_s27 + $0x48] sm:$0xff]  ;;  %v252_v29 = vmul.f32 %v150_v2, %v150_v2  ;;  %v159_v31 = vld [vmem:[%s673_s27 + $0x50] sm:$0xff]  ;;  %v160_v33 = vld [vmem:[%s673_s27 + $0x58] sm:$0xff] }
  0x1e   : > { %v186_v11 = vadd.f32 %v185_v6, %v184_v8  ;;  %v199_v27 = vsel %vm181_vm1, %v158_v25, 0.0  ;;  %v253_v30 = vmul.f32 %v151_v3, %v151_v3  ;;  %v201_v34 = vsel %vm181_vm1, %v159_v31, 0.0  ;;  %v161_v42 = vld [vmem:[%s673_s27 + $0x60] sm:$0xff]  ;;  %v162_v48 = vld [vmem:[%s673_s27 + $0x68] sm:$0xff]  ;;  %v163_v54 = vld [vmem:[%s673_s27 + $0x70] sm:$0xff]  ;;  %p524_p5 = pnand %p523_p3, %p517_p0 }
  0x1f   : > { %v254_v35 = vmul.f32 %v152_v7, %v152_v7  ;;  %v203_v37 = vsel %vm181_vm1, %v160_v33, 0.0  ;;  %v255_v38 = vmul.f32 %v153_v10, %v153_v10  ;;  %v283_v39 = vsel %vm181_vm1, %v251_v28, 0.0  ;;  %v164_v60 = vld [vmem:[%s673_s27 + $0x78] sm:$0xff]  ;;  %v165_v2 = vld [vmem:[%s673_s27 + $0x80] sm:$0xff]  ;;  %v166_v8 = vld [vmem:[%s673_s27 + $0x88] sm:$0xff] }
  0x20   : > { %v188_v14 = vadd.f32 %v187_v9, %v186_v11  ;;  %v284_v40 = vsel %vm181_vm1, %v252_v29, 0.0  ;;  %v286_v41 = vsel %vm181_vm1, %v253_v30, 0.0  ;;  %v205_v45 = vsel %vm181_vm1, %v161_v42, 0.0 }
  0x21   : > { %v285_v44 = vadd.f32 %v284_v40, %v283_v39  ;;  %v256_v46 = vmul.f32 %v154_v13, %v154_v13  ;;  %v288_v47 = vsel %vm181_vm1, %v254_v35, 0.0  ;;  %v207_v51 = vsel %vm181_vm1, %v162_v48, 0.0 }
  0x22   : > { %v190_v17 = vadd.f32 %v189_v12, %v188_v14  ;;  %v257_v52 = vmul.f32 %v155_v16, %v155_v16  ;;  %v290_v53 = vsel %vm181_vm1, %v255_v38, 0.0  ;;  %v209_v57 = vsel %vm181_vm1, %v163_v54, 0.0  ;;  %v167_v14 = vld [vmem:[%s673_s27 + $0x90] sm:$0xff] }
  0x23   : > { %v287_v50 = vadd.f32 %v286_v41, %v285_v44  ;;  %v258_v58 = vmul.f32 %v156_v19, %v156_v19  ;;  %v292_v59 = vsel %vm181_vm1, %v256_v46, 0.0  ;;  %v211_v63 = vsel %vm181_vm1, %v164_v60, 0.0  ;;  %v171_v38 = vld [vmem:[%s673_s27 + $0xb0] sm:$0xff]  ;;  %v172_v44 = vld [vmem:[%s673_s27 + $0xb8] sm:$0xff] }
  0x24   : > { %v192_v20 = vadd.f32 %v191_v15, %v190_v17  ;;  %v259_v0 = vmul.f32 %v157_v22, %v157_v22  ;;  %v294_v1 = vsel %vm181_vm1, %v257_v52, 0.0  ;;  %v213_v5 = vsel %vm181_vm1, %v165_v2, 0.0 }
  0x25   : > { %v289_v56 = vadd.f32 %v288_v47, %v287_v50  ;;  %v260_v6 = vmul.f32 %v158_v25, %v158_v25  ;;  %v296_v7 = vsel %vm181_vm1, %v258_v58, 0.0  ;;  %v215_v11 = vsel %vm181_vm1, %v166_v8, 0.0  ;;  %v173_v50 = vld [vmem:[%s673_s27 + $0xc0] sm:$0xff] }
  0x26   : > { %v194_v23 = vadd.f32 %v193_v18, %v192_v20  ;;  %v261_v12 = vmul.f32 %v159_v31, %v159_v31  ;;  %v298_v13 = vsel %vm181_vm1, %v259_v0, 0.0  ;;  %v217_v17 = vsel %vm181_vm1, %v167_v14, 0.0  ;;  %v168_v20 = vld [vmem:[%s673_s27 + $0x98] sm:$0xff] }
  0x27   : > { %v291_v62 = vadd.f32 %v290_v53, %v289_v56  ;;  %v262_v18 = vmul.f32 %v160_v33, %v160_v33  ;;  %v300_v19 = vsel %vm181_vm1, %v260_v6, 0.0  ;;  %v264_v30 = vmul.f32 %v162_v48, %v162_v48  ;;  %v174_v56 = vld [vmem:[%s673_s27 + $0xc8] sm:$0xff] }
  0x28   : > { %v196_v26 = vadd.f32 %v195_v21, %v194_v23  ;;  %v219_v23 = vsel %vm181_vm1, %v168_v20, 0.0  ;;  %v302_v25 = vsel %vm181_vm1, %v261_v12, 0.0  ;;  %v225_v41 = vsel %vm181_vm1, %v171_v38, 0.0 }
  0x29   : > { %v293_v4 = vadd.f32 %v292_v59, %v291_v62  ;;  %v304_v31 = vsel %vm181_vm1, %v262_v18, 0.0  ;;  %v227_v47 = vsel %vm181_vm1, %v172_v44, 0.0  ;;  %v267_v48 = vmul.f32 %v165_v2, %v165_v2  ;;  %v175_v62 = vld [vmem:[%s673_s27 + $0xd0] sm:$0xff] }
  0x2a   : > { %v198_v32 = vadd.f32 %v197_v24, %v196_v26  ;;  %v263_v24 = vmul.f32 %v161_v42, %v161_v42  ;;  %v169_v26 = vld [vmem:[%s673_s27 + $0xa0] sm:$0xff]  ;;  %v266_v42 = vmul.f32 %v164_v60, %v164_v60  ;;  %v229_v53 = vsel %vm181_vm1, %v173_v50, 0.0 }
  0x2b   : > { %v295_v10 = vadd.f32 %v294_v1, %v293_v4  ;;  %v221_v29 = vsel %vm181_vm1, %v169_v26, 0.0  ;;  %v231_v59 = vsel %vm181_vm1, %v174_v56, 0.0  ;;  %v269_v60 = vmul.f32 %v167_v14, %v167_v14  ;;  %v176_v4 = vld [vmem:[%s673_s27 + $0xd8] sm:$0xff] }
  0x2c   : > { %v200_v36 = vadd.f32 %v199_v27, %v198_v32  ;;  %v170_v32 = vld [vmem:[%s673_s27 + $0xa8] sm:$0xff]  ;;  %v233_v1 = vsel %vm181_vm1, %v175_v62, 0.0  ;;  %v270_v2 = vmul.f32 %v168_v20, %v168_v20  ;;  %v273_v20 = vmul.f32 %v171_v38, %v171_v38 }
  0x2d   : > { %v297_v16 = vadd.f32 %v296_v7, %v295_v10  ;;  %v223_v35 = vsel %vm181_vm1, %v170_v32, 0.0  ;;  %v235_v7 = vsel %vm181_vm1, %v176_v4, 0.0  ;;  %v177_v10 = vld [vmem:[%s673_s27 + $0xe0] sm:$0xff]  ;;  %v272_v14 = vmul.f32 %v170_v32, %v170_v32 }
  0x2e   : > { %v202_v43 = vadd.f32 %v201_v34, %v200_v36  ;;  %v265_v36 = vmul.f32 %v163_v54, %v163_v54  ;;  %v268_v54 = vmul.f32 %v166_v8, %v166_v8  ;;  %v271_v8 = vmul.f32 %v169_v26, %v169_v26  ;;  %v179_v26 = vld [vmem:[%s673_s27 + $0xf0] sm:$0xff] }
  0x2f   : > { %v299_v22 = vadd.f32 %v298_v13, %v297_v16  ;;  %v237_v13 = vsel %vm181_vm1, %v177_v10, 0.0  ;;  %v178_v16 = vld [vmem:[%s673_s27 + $0xe8] sm:$0xff] }
  0x30   : > { %v204_v49 = vadd.f32 %v203_v37, %v202_v43  ;;  %v306_v37 = vsel %vm181_vm1, %v263_v24, 0.0  ;;  %v308_v43 = vsel %vm181_vm1, %v264_v30, 0.0  ;;  %v274_v24 = vmul.f32 %v172_v44, %v172_v44 }
  0x31   : > { %v301_v28 = vadd.f32 %v300_v19, %v299_v22  ;;  %v239_v19 = vsel %vm181_vm1, %v178_v16, 0.0  ;;  %v275_v30 = vmul.f32 %v173_v50, %v173_v50 }
  0x32   : > { %v206_v55 = vadd.f32 %v205_v45, %v204_v49  ;;  %v310_v49 = vsel %vm181_vm1, %v265_v36, 0.0 }
  0x33   : > { %v303_v34 = vadd.f32 %v302_v25, %v301_v28  ;;  %v324_v25 = vsel %vm181_vm1, %v272_v14, 0.0 }
  0x34   : > { %v208_v61 = vadd.f32 %v207_v51, %v206_v55  ;;  %v312_v55 = vsel %vm181_vm1, %v266_v42, 0.0  ;;  %v278_v42 = vmul.f32 %v176_v4, %v176_v4 }
  0x35   : > { %v305_v40 = vadd.f32 %v304_v31, %v303_v34  ;;  %v326_v31 = vsel %vm181_vm1, %v273_v20, 0.0  ;;  %v328_v34 = vsel %vm181_vm1, %v274_v24, 0.0 }
  0x36   : > { %v210_v3 = vadd.f32 %v209_v57, %v208_v61  ;;  %v314_v61 = vsel %vm181_vm1, %v267_v48, 0.0  ;;  %v336_v50 = vsel %vm181_vm1, %v278_v42, 0.0 }
  0x37   : > { %v307_v46 = vadd.f32 %v306_v37, %v305_v40  ;;  %v330_v40 = vsel %vm181_vm1, %v275_v30, 0.0 }
  0x38   : > { %v212_v9 = vadd.f32 %v211_v63, %v210_v3  ;;  %v316_v3 = vsel %vm181_vm1, %v268_v54, 0.0 }
  0x39   : > { %v309_v52 = vadd.f32 %v308_v43, %v307_v46  ;;  %v279_v46 = vmul.f32 %v177_v10, %v177_v10 }
  0x3a   : > { %v214_v15 = vadd.f32 %v213_v5, %v212_v9  ;;  %v318_v9 = vsel %vm181_vm1, %v269_v60, 0.0 }
  0x3b   : > { %v311_v58 = vadd.f32 %v310_v49, %v309_v52  ;;  %v280_v49 = vmul.f32 %v178_v16, %v178_v16  ;;  %v338_v54 = vsel %vm181_vm1, %v279_v46, 0.0 }
  0x3c   : > { %v216_v21 = vadd.f32 %v215_v11, %v214_v15  ;;  %v320_v15 = vsel %vm181_vm1, %v270_v2, 0.0 }
  0x3d   : > { %v313_v0 = vadd.f32 %v312_v55, %v311_v58 }
  0x3e   : > { %v218_v27 = vadd.f32 %v217_v17, %v216_v21  ;;  %v322_v21 = vsel %vm181_vm1, %v271_v8, 0.0 }
  0x3f   : > { %v315_v6 = vadd.f32 %v314_v61, %v313_v0 }
  0x40   : > { %v220_v33 = vadd.f32 %v219_v23, %v218_v27 }
  0x41   : > { %v317_v12 = vadd.f32 %v316_v3, %v315_v6 }
  0x42   : > { %v222_v39 = vadd.f32 %v221_v29, %v220_v33  ;;  %v241_v29 = vsel %vm181_vm1, %v179_v26, 0.0  ;;  %v276_v33 = vmul.f32 %v174_v56, %v174_v56 }
  0x43   : > { %v319_v18 = vadd.f32 %v318_v9, %v317_v12 }
  0x44   : > { %v224_v45 = vadd.f32 %v223_v35, %v222_v39  ;;  %v180_v35 = vld [vmem:[%s673_s27 + $0xf8] sm:$0xff]  ;;  %v277_v39 = vmul.f32 %v175_v62, %v175_v62  ;;  %v332_v43 = vsel %vm181_vm1, %v276_v33, 0.0 }
  0x45   : > { %v321_v23 = vadd.f32 %v320_v15, %v319_v18  ;;  %v243_v38 = vsel %vm181_vm1, %v180_v35, 0.0  ;;  %v282_v56 = vmul.f32 %v180_v35, %v180_v35 }
  0x46   : > { %v226_v51 = vadd.f32 %v225_v41, %v224_v45 }
  0x47   : > { %v323_v28 = vadd.f32 %v322_v21, %v321_v23  ;;  %v344_v62 = vsel %vm181_vm1, %v282_v56, 0.0 }
  0x48   : > { %v228_v57 = vadd.f32 %v227_v47, %v226_v51  ;;  %v334_v47 = vsel %vm181_vm1, %v277_v39, 0.0 }
  0x49   : > { %v325_v32 = vadd.f32 %v324_v25, %v323_v28 }
  0x4a   : > { %v230_v63 = vadd.f32 %v229_v53, %v228_v57  ;;  %v281_v53 = vmul.f32 %v179_v26, %v179_v26  ;;  %v340_v57 = vsel %vm181_vm1, %v280_v49, 0.0 }
  0x4b   : > { %v327_v37 = vadd.f32 %v326_v31, %v325_v32 }
  0x4c   : > { %v232_v5 = vadd.f32 %v231_v59, %v230_v63  ;;  %v342_v60 = vsel %vm181_vm1, %v281_v53, 0.0 }
  0x4d   : > { %v329_v41 = vadd.f32 %v328_v34, %v327_v37 }
  0x4e   : > { %v234_v11 = vadd.f32 %v233_v1, %v232_v5 }
  0x4f   : > { %v331_v45 = vadd.f32 %v330_v40, %v329_v41 }
  0x50   : > { %v236_v17 = vadd.f32 %v235_v7, %v234_v11  ;;  %v354_v11 = vld [vmem:[%s666_s23] sm:$0x3] }
  0x51   : > { %v333_v48 = vadd.f32 %v332_v43, %v331_v45 }
  0x52   : > { %v238_v22 = vadd.f32 %v237_v13, %v236_v17 }
  0x53   : > { %v335_v52 = vadd.f32 %v334_v47, %v333_v48 }
  0x54   : > { %v240_v27 = vadd.f32 %v239_v19, %v238_v22 }
  0x55   : > { %v337_v55 = vadd.f32 %v336_v50, %v335_v52 }
  0x56   : > { %v242_v36 = vadd.f32 %v241_v29, %v240_v27 }
  0x57   : > { %v339_v59 = vadd.f32 %v338_v54, %v337_v55 }
  0x58   : > { %v244_v44 = vadd.f32 %v243_v38, %v242_v36 }
  0x59   : > { %v341_v61 = vadd.f32 %v340_v57, %v339_v59 }
  0x5a   : > { %v245_v51 = vrot.slane %v244_v44, 4 }
  0x5b   : > { %v343_v0 = vadd.f32 %v342_v60, %v341_v61 }
  0x5c   : > { %v246_v58 = vadd.f32 %v245_v51, %v244_v44 }
  0x5d   : > { %v345_v1 = vadd.f32 %v344_v62, %v343_v0 }
  0x5e   : > { %v247_v63 = vrot.slane %v246_v58, 2 }
  0x5f   : > { %v346_v3 = vrot.slane %v345_v1, 4 }
  0x60   : > { %v248_v2 = vadd.f32 %v247_v63, %v246_v58 }
  0x61   : > { %v347_v4 = vadd.f32 %v346_v3, %v345_v1 }
  0x62   : > { %v249_v5 = vrot.slane %v248_v2, 1 }
  0x63   : > { %v348_v6 = vrot.slane %v347_v4, 2 }
  0x64   : > { %v250_v8 = vadd.f32 %v249_v5, %v248_v2 }
  0x65   : > { %v349_v7 = vadd.f32 %v348_v6, %v347_v4 }
  0x67   : > { %v350_v9 = vrot.slane %v349_v7, 1 }
  0x69   : > { %v351_v10 = vadd.f32 %v350_v9, %v349_v7 }
  0x6b   : > { %v353_v12 = vsel %vm352_vm2, %v250_v8, %v351_v10 }
  0x6c   : > { %v355_v13 = vadd.f32 %v354_v11, %v353_v12 }
  0x6e   : > { %357 = vst.msk [vmem:[%s666_s23] sm:$0x3] %vm147_vm0, %v355_v13 }
  0x6f   : > { %527 = shalt.err (!%p524_p5)
}
  0x70   : > { %s528_s15 = scalar_lea.hbm %s777_s3, 32  ;;  %s532_s21 = scalar_lea.hbm %s829_s1, 64 }
  0x71   : > { %p529_p6 = scmp.ne.s32.totalorder %s777_s3, %s528_s15  ;;  %p533_p10 = scmp.lt.u32.totalorder %s777_s3, %s829_s1 }
  0x72   : > { %p534_p11 = scmp.lt.u32.totalorder %s532_s21, %s528_s15  ;;  %p536_p13 = scmp.lt.u32.totalorder %s528_s15, %s777_s3 }
  0x73   : > { %p530_p7 = pnand %p529_p6, %p646_p4 }
  0x74   : > { %p535_p12 = por %p534_p11, %p533_p10 }
  0x75   : > { %p531_p9 = pneg %p530_p7 }
  0x76   : > { %p537_p0 = por %p536_p13, %p535_p12 }
  0x78   : > { %p538_p1 = pnand %p537_p0, %p531_p9 }
  0x7a   : > { %541 = shalt.err (!%p538_p1)
}
  0x7b   : > { %458 = dma.vmem_to_hbm [thread:$0]  (%p646_p4), %s779_s29, 32, %s777_s3, %s359_s4  }
  0x7c PF: > { %p464_p2 = scmp.ge.s32.totalorder %s592_s11, 2  ;;  %s384_s24 = sand.u32 1, %s572_s6  }
  0x7d   : > { %s385_s25 = scalar_lea.sflag [#allocation3], %s384_s24 }
  0x7e   : > { %p461_p3 = pnand %p464_p2, %p653_p8 }
  0x80   : > { %567 = dma.done.wait (!%p461_p3), %s385_s25, 32  }
  0x81   : > { %569 = vsyncadd (!%p461_p3), %s385_s25, 4294967264  ;;  %s14_s11 = sadd.s32 1, %s592_s11   ;;  %s832_s6 = smov %s576_s7 }
  0x82   : > { %p11_p5 = scmp.ge.s32.totalorder %s14_s11, 4   ;;  %s833_s7 = smov %s580_s8 }
  0x83   : > { %s834_s8 = smov %s659_s19  ;;  %s835_s9 = smov %s588_s10 }
  0x84   : > { %s836_s10 = smov %s838_s14  ;;  %13 = sbr.rel (!%p11_p5) target bundleno = 4 (0x4), region = 63 }
  0x8b   :  { %390 = vsyncpa [#allocation3], 1 }
  0x8c   :  { %392 = vsyncpa [#allocation3 + $0x1], 1 }

</bundles_post_ra>
